<compile_context>
chip_gen: v7x
topology: tpu7x:2x2x1
jax: 0.10.0
libtpu: 0.0.40
codegen_flags: <defaults>
</compile_context>

<pallas_src>
import math

import jax
import jax.numpy as jnp
from jax.experimental import pallas as pl
from jax.experimental.pallas import tpu as pltpu


_GELU_C = math.sqrt(2.0 / math.pi)


def _gelu_tanh(x):
    # Matches torch.nn.GELU(approximate='tanh').
    return 0.5 * x * (1.0 + jnp.tanh(_GELU_C * (x + 0.044715 * (x * x * x))))


def pos_mlp_kernel(x_ref, w1_ref, b1_ref, w2_ref, wr_ref, bo_ref, o_ref):
    # x_ref: (B, T*FIN) — whole (tiny) problem resident in VMEM, one step.
    x = x_ref[...]

    # Hidden layer: block-diag matmul + bias + tanh-GELU (EUP).
    h = jnp.dot(x, w1_ref[...], preferred_element_type=jnp.float32) + b1_ref[...]
    h = _gelu_tanh(h)                                                   # (B, T*HID)

    # Output layer + residual Linear, biases pre-folded (bo = b2 + br).
    y = jnp.dot(h, w2_ref[...], preferred_element_type=jnp.float32)
    y += jnp.dot(x, wr_ref[...], preferred_element_type=jnp.float32)
    y += bo_ref[...]

    o_ref[...] = y.astype(o_ref.dtype)                                  # (B, T*FOUT)


def _block_diag(w):
    """(T, fin, fout) per-position weights -> (T*fin, T*fout) block-diagonal."""
    t, fin, fout = w.shape
    eye = jnp.eye(t, dtype=w.dtype)
    return jnp.einsum("tio,ts->tiso", w, eye).reshape(t * fin, t * fout)


def pack_params(w1, b1, w2, b2, wr, br):
    """One-time host-side repack of the per-position Linears.

    w1: (T, FIN, HID)   b1: (T, HID)
    w2: (T, HID, FOUT)  b2: (T, FOUT)
    wr: (T, FIN, FOUT)  br: (T, FOUT)     (residual connector Linear)
    """
    T, _, HID = w1.shape
    FOUT = w2.shape[-1]
    return dict(
        w1b=_block_diag(w1),                     # (T*FIN, T*HID)
        b1f=b1.reshape(1, T * HID),
        w2b=_block_diag(w2),                     # (T*HID, T*FOUT)
        wrb=_block_diag(wr),                     # (T*FIN, T*FOUT)
        bof=(b2 + br).reshape(1, T * FOUT),      # folded output + residual bias
    )


def advanced_positional_bias_mlp(x, packed):
    """x: (B, T, FIN) -> (B, T, FOUT)."""
    B, T, FIN = x.shape
    TFOUT = packed["w2b"].shape[-1]

    x2 = x.reshape(B, T * FIN)                   # positions folded onto lanes

    vmem = pl.BlockSpec(memory_space=pltpu.MemorySpace.VMEM)
    y2 = pl.pallas_call(
        pos_mlp_kernel,
        out_shape=jax.ShapeDtypeStruct((B, TFOUT), x.dtype),
        in_specs=[vmem] * 6,
        out_specs=vmem,
    )(x2, packed["w1b"], packed["b1f"], packed["w2b"], packed["wrb"], packed["bof"])

    return y2.reshape(B, T, TFOUT // T)


def reference(x, w1, b1, w2, b2, wr, br):
    """Pure-JAX reference matching the PyTorch eval-mode forward."""
    hp = jax.lax.Precision.HIGHEST
    h = jnp.einsum("bti,tih->bth", x, w1, precision=hp) + b1[None]
    h = _gelu_tanh(h)
    y = jnp.einsum("bth,tho->bto", h, w2, precision=hp) + b2[None]
    r = jnp.einsum("bti,tio->bto", x, wr, precision=hp) + br[None]
    return y + r


if __name__ == "__main__":
    # context_width T=8, in_features=16, hidden=32, out_features=32, batch=2.
    # (in != out -> the residual connector is a Linear, per the module.)
    B, T, FIN, HID, FOUT = 2, 8, 16, 32, 32

    key = jax.random.PRNGKey(0)
    kx, k1, kb1, k2, kb2, kr, kbr = jax.random.split(key, 7)

    def uinit(k, shape, fan_in):
        bound = 1.0 / math.sqrt(fan_in)
        return jax.random.uniform(k, shape, jnp.float32, -bound, bound)

    x = jax.random.normal(kx, (B, T, FIN), jnp.float32)

    w1 = uinit(k1, (T, FIN, HID), FIN)     # per-position first Linear
    b1 = uinit(kb1, (T, HID), FIN)
    w2 = uinit(k2, (T, HID, FOUT), HID)    # per-position output Linear
    b2 = uinit(kb2, (T, FOUT), HID)
    wr = uinit(kr, (T, FIN, FOUT), FIN)    # per-position residual Linear
    br = uinit(kbr, (T, FOUT), FIN)

    packed = jax.tree_util.tree_map(jax.block_until_ready,
                                    pack_params(w1, b1, w2, b2, wr, br))

    fwd = jax.jit(advanced_positional_bias_mlp)
    y = jax.block_until_ready(fwd(x, packed))

    y_ref = reference(x, w1, b1, w2, b2, wr, br)
    assert y.shape == (B, T, FOUT)
    assert jnp.allclose(y, y_ref, atol=1e-3, rtol=1e-3), "mismatch vs reference"

    print("KERNEL_OK")
</pallas_src>

<mosaic_0001>
module attributes {stable_mosaic.version = 11 : i64} {
  func.func @pos_mlp_kernel(%arg0: memref<2x128xf32, #tpu.memory_space<vmem>>, %arg1: memref<128x256xf32, #tpu.memory_space<vmem>>, %arg2: memref<1x256xf32, #tpu.memory_space<vmem>>, %arg3: memref<256x256xf32, #tpu.memory_space<vmem>>, %arg4: memref<128x256xf32, #tpu.memory_space<vmem>>, %arg5: memref<1x256xf32, #tpu.memory_space<vmem>>, %arg6: memref<2x256xf32, #tpu.memory_space<vmem>>) attributes {dimension_semantics = [], scalar_prefetch = 0 : i64, scratch_operands = 0 : i64, tpu.core_type = #tpu.core_type<tc>} {
    %c0 = arith.constant 0 : index
    %c0_0 = arith.constant 0 : index
    %0 = vector.load %arg0[%c0, %c0_0] : memref<2x128xf32, #tpu.memory_space<vmem>>, vector<2x128xf32>
    %c0_1 = arith.constant 0 : index
    %c0_2 = arith.constant 0 : index
    %1 = vector.load %arg1[%c0_1, %c0_2] : memref<128x256xf32, #tpu.memory_space<vmem>>, vector<128x256xf32>
    %cst = arith.constant dense<0.000000e+00> : vector<2x256xf32>
    %2 = tpu.matmul %0, %1, %cst {dimension_numbers = #tpu.dot_dimension_numbers<[1], [0], [0], [1], [0, 0, 1, 1], [], []>} : vector<2x128xf32>, vector<128x256xf32>, vector<2x256xf32> -> vector<2x256xf32>
    %c0_3 = arith.constant 0 : index
    %c0_4 = arith.constant 0 : index
    %3 = vector.load %arg2[%c0_3, %c0_4] : memref<1x256xf32, #tpu.memory_space<vmem>>, vector<1x256xf32>
    %4 = vector.broadcast %3 : vector<1x256xf32> to vector<2x256xf32>
    %5 = arith.addf %2, %4 : vector<2x256xf32>
    %cst_5 = arith.constant 5.000000e-01 : f32
    %6 = vector.broadcast %cst_5 : f32 to vector<2x256xf32>
    %7 = arith.mulf %6, %5 : vector<2x256xf32>
    %8 = arith.mulf %5, %5 : vector<2x256xf32>
    %9 = arith.mulf %8, %5 : vector<2x256xf32>
    %cst_6 = arith.constant 4.471500e-02 : f32
    %10 = vector.broadcast %cst_6 : f32 to vector<2x256xf32>
    %11 = arith.mulf %10, %9 : vector<2x256xf32>
    %12 = arith.addf %5, %11 : vector<2x256xf32>
    %cst_7 = arith.constant 0.797884583 : f32
    %13 = vector.broadcast %cst_7 : f32 to vector<2x256xf32>
    %14 = arith.mulf %13, %12 : vector<2x256xf32>
    %15 = math.tanh %14 : vector<2x256xf32>
    %cst_8 = arith.constant 1.000000e+00 : f32
    %16 = vector.broadcast %cst_8 : f32 to vector<2x256xf32>
    %17 = arith.addf %16, %15 : vector<2x256xf32>
    %18 = arith.mulf %7, %17 : vector<2x256xf32>
    %c0_9 = arith.constant 0 : index
    %c0_10 = arith.constant 0 : index
    %19 = vector.load %arg3[%c0_9, %c0_10] : memref<256x256xf32, #tpu.memory_space<vmem>>, vector<256x256xf32>
    %cst_11 = arith.constant dense<0.000000e+00> : vector<2x256xf32>
    %20 = tpu.matmul %18, %19, %cst_11 {dimension_numbers = #tpu.dot_dimension_numbers<[1], [0], [0], [1], [0, 0, 1, 1], [], []>} : vector<2x256xf32>, vector<256x256xf32>, vector<2x256xf32> -> vector<2x256xf32>
    %c0_12 = arith.constant 0 : index
    %c0_13 = arith.constant 0 : index
    %21 = vector.load %arg4[%c0_12, %c0_13] : memref<128x256xf32, #tpu.memory_space<vmem>>, vector<128x256xf32>
    %cst_14 = arith.constant dense<0.000000e+00> : vector<2x256xf32>
    %22 = tpu.matmul %0, %21, %cst_14 {dimension_numbers = #tpu.dot_dimension_numbers<[1], [0], [0], [1], [0, 0, 1, 1], [], []>} : vector<2x128xf32>, vector<128x256xf32>, vector<2x256xf32> -> vector<2x256xf32>
    %23 = arith.addf %20, %22 : vector<2x256xf32>
    %c0_15 = arith.constant 0 : index
    %c0_16 = arith.constant 0 : index
    %24 = vector.load %arg5[%c0_15, %c0_16] : memref<1x256xf32, #tpu.memory_space<vmem>>, vector<1x256xf32>
    %25 = vector.broadcast %24 : vector<1x256xf32> to vector<2x256xf32>
    %26 = arith.addf %23, %25 : vector<2x256xf32>
    %c0_17 = arith.constant 0 : index
    %c0_18 = arith.constant 0 : index
    %27 = vector.load %arg6[%c0_17, %c0_18] : memref<2x256xf32, #tpu.memory_space<vmem>>, vector<2x256xf32>
    tpu.vector_store %arg6[%c0_17, %c0_18], %26 {strides = array<i32>} : memref<2x256xf32, #tpu.memory_space<vmem>>, vector<2x256xf32>,
    return
  }
}

</mosaic_0001>

<bundles_post_ra>
// kernel: advanced_positional_bias_mlp.1
= control target key start
LH: loop header
LB: loop body
LE: loop exit
PB: predicated region body
PF: predicated region fallthrough
CT: control target
= control target key end

     0   :  { %11 = vsyncpa [#allocation3], 0  ;;  %s790_s0 = inlined_call_operand.vmem [shape: f32[2,128], index: 0, kind: input, shape index: {}]   ;;  %s791_s1 = inlined_call_operand.hbm [shape: f32[128,256], index: 1, kind: input, shape index: {}]   ;;  %s792_s2 = inlined_call_operand.vmem [shape: f32[1,256], index: 2, kind: input, shape index: {}]   ;;  %s793_s3 = inlined_call_operand.hbm [shape: f32[256,256], index: 3, kind: input, shape index: {}]   ;;  %s794_s4 = inlined_call_operand.hbm [shape: f32[128,256], index: 4, kind: input, shape index: {}]   ;;  %s795_s5 = inlined_call_operand.vmem [shape: f32[1,256], index: 5, kind: input, shape index: {}]   ;;  %s796_s6 = inlined_call_operand.vmem [shape: f32[2,256], index: 6, kind: output, shape index: {}]  }
   0x1   :  { %12 = vsyncpa [#allocation5], 0  ;;  %s679_s21 = smov [#allocation4]   ;;  %s680_s23 = smov [#allocation2]  }
   0x2   :  { %s34_s22 = sshll.u32 %s679_s21, 4  ;;  %s20_s24 = sshll.u32 %s680_s23, 4  ;;  %s35_s22 = int_to_ptr.vmem [resolvable:$true] %s34_s22  ;;  %s720_s24 = int_to_ptr.vmem [resolvable:$true] %s20_s24 }
   0x3   :  { %s609_s27 = scalar_lea.hbm %s793_s3, 8192 }
   0x4   :  { %p610_p0 = scmp.ne.s32.totalorder %s793_s3, %s609_s27  ;;  %p613_p1 = scmp.lt.u32.totalorder %s609_s27, %s793_s3 }
   0x6   :  { %p615_p2 = pnand %p613_p1, %p610_p0 }
   0x8   :  { %618 = shalt.err (!%p615_p2)
}
   0x9   :  { %s619_s8 = scalar_lea.vmem %s35_s22, 8192  ;;  %p624_p4 = scmp.lt.s32.totalorder %s35_s22, %s35_s22 }
   0xa   :  { %p620_p3 = scmp.ne.s32.totalorder %s35_s22, %s619_s8  ;;  %p625_p5 = scmp.lt.s32.totalorder %s619_s8, %s619_s8 }
   0xc   :  { %p626_p6 = por %p625_p5, %p624_p4 }
   0xe   :  { %p627_p7 = pnand %p626_p6, %p620_p3 }
  0x10   :  { %630 = shalt.err (!%p627_p7)
}
  0x11   :  { %s681_s9 = smov 256   ;;  %s682_s10 = smov 16  }
  0x12   :  { %40 = dma.hbm_to_vmem [thread:$0]  %s793_s3, 8192, %s35_s22, [#allocation5], %s681_s9, %s681_s9, %s682_s10  }
  0x13   :  { %s631_s15 = scalar_lea.hbm %s791_s1, 4096 }
  0x14   :  { %p632_p8 = scmp.ne.s32.totalorder %s791_s1, %s631_s15  ;;  %p635_p9 = scmp.lt.u32.totalorder %s631_s15, %s791_s1 }
  0x16   :  { %p637_p10 = pnand %p635_p9, %p632_p8 }
  0x18   :  { %640 = shalt.err (!%p637_p10)
}
  0x19   :  { %s641_s20 = scalar_lea.vmem %s720_s24, 4096  ;;  %p646_p12 = scmp.lt.s32.totalorder %s720_s24, %s720_s24 }
  0x1a   :  { %p642_p11 = scmp.ne.s32.totalorder %s720_s24, %s641_s20  ;;  %p647_p13 = scmp.lt.s32.totalorder %s641_s20, %s641_s20 }
  0x1c   :  { %p648_p0 = por %p647_p13, %p646_p12 }
  0x1e   :  { %p649_p1 = pnand %p648_p0, %p642_p11 }
  0x20   :  { %652 = shalt.err (!%p649_p1)
}
  0x21   :  { %26 = dma.hbm_to_vmem [thread:$0]  %s791_s1, 4096, %s720_s24, [#allocation3], %s681_s9, %s681_s9, %s682_s10  }
  0x22   :  { %s683_s22 = smov [#allocation6]   ;;  %s653_s27 = scalar_lea.hbm %s794_s4, 4096 }
  0x23   :  { %s46_s23 = sshll.u32 %s683_s22, 4  ;;  %p654_p2 = scmp.ne.s32.totalorder %s794_s4, %s653_s27  ;;  %s47_s23 = int_to_ptr.vmem [resolvable:$true] %s46_s23 }
  0x24   :  { %p657_p3 = scmp.lt.u32.totalorder %s653_s27, %s794_s4 }
  0x26   :  { %p659_p4 = pnand %p657_p3, %p654_p2 }
  0x28   :  { %662 = shalt.err (!%p659_p4)
}
  0x29   :  { %s663_s8 = scalar_lea.vmem %s47_s23, 4096  ;;  %p668_p6 = scmp.lt.s32.totalorder %s47_s23, %s47_s23 }
  0x2a   :  { %p664_p5 = scmp.ne.s32.totalorder %s47_s23, %s663_s8  ;;  %p669_p7 = scmp.lt.s32.totalorder %s663_s8, %s663_s8 }
  0x2c   :  { %p670_p8 = por %p669_p7, %p668_p6 }
  0x2e   :  { %p671_p9 = pnand %p670_p8, %p664_p5 }
  0x30   :  { %674 = shalt.err (!%p671_p9)
}
  0x31   :  { %52 = dma.hbm_to_vmem [thread:$0]  %s794_s4, 4096, %s47_s23, [#allocation5], %s681_s9, %s681_s9, %s682_s10  }
  0x32   :  { %675 = dma.done.wait [#allocation3], 4096  }
  0x33   :  { %676 = vsyncadd [#allocation3], 4294963200 }
  0x34   :  { %677 = dma.done.wait [#allocation5], 12288  }
  0x35   :  { %678 = vsyncadd [#allocation5], 4294955008  ;;  %v684_v0 = vmov 0.0   ;;  %v66_v1 = vld [vmem:[#allocation2 + $0x8] sm:$0xff]  ;;  %v68_v2 = vld [vmem:[#allocation2 + $0x18] sm:$0xff] }
  0x36   :  { %173 = vmatprep.mubr.f32.mxu0 %v684_v0  ;;  %v65_v3 = vld [vmem:[#allocation2] sm:$0xff]  ;;  %v469_v4 = vpack.c.bf16 %v68_v2, %v66_v1  ;;  %v67_v5 = vld [vmem:[#allocation2 + $0x10] sm:$0xff]  ;;  %v70_v6 = vld [vmem:[#allocation2 + $0x28] sm:$0xff] }
  0x37   :  { %v72_v7 = vld [vmem:[#allocation2 + $0x38] sm:$0xff]  ;;  %v471_v8 = vpack.c.bf16 %v67_v5, %v65_v3  ;;  %v69_v10 = vld [vmem:[#allocation2 + $0x20] sm:$0xff]  ;;  %v71_v11 = vld [vmem:[#allocation2 + $0x30] sm:$0xff] }
  0x38   :  { %v473_v9 = vpack.c.bf16 %v72_v7, %v70_v6  ;;  %v74_v12 = vld [vmem:[#allocation2 + $0x48] sm:$0xff]  ;;  %470 = vmatprep.subr.bf16.mxu0 %v469_v4  ;;  %v76_v13 = vld [vmem:[#allocation2 + $0x58] sm:$0xff]  ;;  %v475_v14 = vpack.c.bf16 %v71_v11, %v69_v10  ;;  %v73_v16 = vld [vmem:[#allocation2 + $0x40] sm:$0xff] }
  0x39   :  { %472 = vmatpush1.bf16.msra.mxu0 %v471_v8  ;;  %v477_v15 = vpack.c.bf16 %v76_v13, %v74_v12  ;;  %v75_v17 = vld [vmem:[#allocation2 + $0x50] sm:$0xff]  ;;  %v78_v18 = vld [vmem:[#allocation2 + $0x68] sm:$0xff]  ;;  %v80_v19 = vld [vmem:[#allocation2 + $0x78] sm:$0xff] }
  0x3a   :  { %474 = vmatprep.subr.bf16.mxu0 %v473_v9  ;;  %v479_v20 = vpack.c.bf16 %v75_v17, %v73_v16  ;;  %v481_v21 = vpack.c.bf16 %v80_v19, %v78_v18  ;;  %v77_v22 = vld [vmem:[#allocation2 + $0x60] sm:$0xff]  ;;  %v79_v23 = vld [vmem:[#allocation2 + $0x70] sm:$0xff]  ;;  %v82_v24 = vld [vmem:[#allocation2 + $0x88] sm:$0xff] }
  0x3b   :  { %v84_v25 = vld [vmem:[#allocation2 + $0x98] sm:$0xff]  ;;  %v81_v26 = vld [vmem:[#allocation2 + $0x80] sm:$0xff]  ;;  %v83_v27 = vld [vmem:[#allocation2 + $0x90] sm:$0xff]  ;;  %v483_v31 = vpack.c.bf16 %v79_v23, %v77_v22 }
  0x3c   :  { %v199_v28 = vld [vmem:[#allocation4 + $0x8] sm:$0xff]  ;;  %v201_v29 = vld [vmem:[#allocation4 + $0x18] sm:$0xff]  ;;  %v198_v30 = vld [vmem:[#allocation4] sm:$0xff]  ;;  %v485_v36 = vpack.c.bf16 %v84_v25, %v82_v24  ;;  %v487_v46 = vpack.c.bf16 %v83_v27, %v81_v26 }
  0x3d   :  { %476 = vmatpush1.bf16.msra.mxu0 %v475_v14  ;;  %v533_v32 = vpack.c.bf16 %v201_v29, %v199_v28  ;;  %v200_v33 = vld [vmem:[#allocation4 + $0x10] sm:$0xff]  ;;  %v203_v34 = vld [vmem:[#allocation4 + $0x28] sm:$0xff]  ;;  %v205_v35 = vld [vmem:[#allocation4 + $0x38] sm:$0xff] }
  0x3e   :  { %478 = vmatprep.subr.bf16.mxu0 %v477_v15  ;;  %v535_v37 = vpack.c.bf16 %v200_v33, %v198_v30  ;;  %v537_v38 = vpack.c.bf16 %v205_v35, %v203_v34  ;;  %v202_v39 = vld [vmem:[#allocation4 + $0x20] sm:$0xff]  ;;  %v204_v40 = vld [vmem:[#allocation4 + $0x30] sm:$0xff]  ;;  %v207_v41 = vld [vmem:[#allocation4 + $0x48] sm:$0xff] }
  0x3f   :  { %v86_v42 = vld [vmem:[#allocation2 + $0xa8] sm:$0xff]  ;;  %v88_v43 = vld [vmem:[#allocation2 + $0xb8] sm:$0xff]  ;;  %534 = vmatprep.subr.bf16.mxu1 %v533_v32  ;;  %v539_v45 = vpack.c.bf16 %v204_v40, %v202_v39  ;;  %v85_v47 = vld [vmem:[#allocation2 + $0xa0] sm:$0xff] }
  0x40   :  { %v209_v44 = vld [vmem:[#allocation4 + $0x58] sm:$0xff]  ;;  %536 = vmatpush1.bf16.msra.mxu1 %v535_v37  ;;  %v206_v49 = vld [vmem:[#allocation4 + $0x40] sm:$0xff]  ;;  %v208_v50 = vld [vmem:[#allocation4 + $0x50] sm:$0xff]  ;;  %v489_v51 = vpack.c.bf16 %v88_v43, %v86_v42 }
  0x41   :  { %480 = vmatpush1.bf16.msra.mxu0 %v479_v20  ;;  %538 = vmatprep.subr.bf16.mxu1 %v537_v38  ;;  %v541_v48 = vpack.c.bf16 %v209_v44, %v207_v41  ;;  %v87_v52 = vld [vmem:[#allocation2 + $0xb0] sm:$0xff]  ;;  %v211_v53 = vld [vmem:[#allocation4 + $0x68] sm:$0xff]  ;;  %v213_v54 = vld [vmem:[#allocation4 + $0x78] sm:$0xff]  ;;  %v543_v57 = vpack.c.bf16 %v208_v50, %v206_v49 }
  0x42   :  { %482 = vmatprep.subr.bf16.mxu0 %v481_v21  ;;  %v90_v55 = vld [vmem:[#allocation2 + $0xc8] sm:$0xff]  ;;  %v92_v56 = vld [vmem:[#allocation2 + $0xd8] sm:$0xff]  ;;  %v491_v58 = vpack.c.bf16 %v87_v52, %v85_v47  ;;  %v89_v59 = vld [vmem:[#allocation2 + $0xc0] sm:$0xff]  ;;  %v545_v60 = vpack.c.bf16 %v213_v54, %v211_v53 }
  0x43   :  { %v210_v61 = vld [vmem:[#allocation4 + $0x60] sm:$0xff]  ;;  %v212_v62 = vld [vmem:[#allocation4 + $0x70] sm:$0xff]  ;;  %v493_v63 = vpack.c.bf16 %v92_v56, %v90_v55  ;;  %v215_v2 = vld [vmem:[#allocation4 + $0x88] sm:$0xff] }
  0x44   :  { %540 = vmatpush1.bf16.msra.mxu1 %v539_v45  ;;  %v91_v1 = vld [vmem:[#allocation2 + $0xd0] sm:$0xff]  ;;  %v217_v3 = vld [vmem:[#allocation4 + $0x98] sm:$0xff]  ;;  %v94_v4 = vld [vmem:[#allocation2 + $0xe8] sm:$0xff]  ;;  %v547_v6 = vpack.c.bf16 %v212_v62, %v210_v61 }
  0x45   :  { %484 = vmatpush1.bf16.msra.mxu0 %v483_v31  ;;  %542 = vmatprep.subr.bf16.mxu1 %v541_v48  ;;  %v96_v5 = vld [vmem:[#allocation2 + $0xf8] sm:$0xff]  ;;  %v495_v7 = vpack.c.bf16 %v91_v1, %v89_v59  ;;  %v93_v8 = vld [vmem:[#allocation2 + $0xe0] sm:$0xff]  ;;  %v549_v9 = vpack.c.bf16 %v217_v3, %v215_v2  ;;  %v216_v11 = vld [vmem:[#allocation4 + $0x90] sm:$0xff] }
  0x46   :  { %486 = vmatprep.subr.bf16.mxu0 %v485_v36  ;;  %v214_v10 = vld [vmem:[#allocation4 + $0x80] sm:$0xff]  ;;  %v497_v12 = vpack.c.bf16 %v96_v5, %v94_v4  ;;  %v95_v13 = vld [vmem:[#allocation2 + $0xf0] sm:$0xff]  ;;  %v219_v14 = vld [vmem:[#allocation4 + $0xa8] sm:$0xff] }
  0x47   :  { %v221_v15 = vld [vmem:[#allocation4 + $0xb8] sm:$0xff]  ;;  %v263_v16 = vld [vmem:[#allocation6 + $0x8] sm:$0xff]  ;;  %v551_v18 = vpack.c.bf16 %v216_v11, %v214_v10  ;;  %v499_v19 = vpack.c.bf16 %v95_v13, %v93_v8  ;;  %v218_v21 = vld [vmem:[#allocation4 + $0xa0] sm:$0xff] }
  0x48   :  { %544 = vmatpush1.bf16.msra.mxu1 %v543_v57  ;;  %v265_v17 = vld [vmem:[#allocation6 + $0x18] sm:$0xff]  ;;  %v553_v20 = vpack.c.bf16 %v221_v15, %v219_v14  ;;  %v220_v22 = vld [vmem:[#allocation4 + $0xb0] sm:$0xff]  ;;  %v223_v23 = vld [vmem:[#allocation4 + $0xc8] sm:$0xff] }
  0x49   :  { %488 = vmatpush1.bf16.msra.mxu0 %v487_v46  ;;  %546 = vmatprep.subr.bf16.mxu1 %v545_v60  ;;  %v225_v24 = vld [vmem:[#allocation4 + $0xd8] sm:$0xff]  ;;  %v501_v25 = vpack.c.bf16 %v265_v17, %v263_v16  ;;  %v262_v26 = vld [vmem:[#allocation6] sm:$0xff]  ;;  %v264_v27 = vld [vmem:[#allocation6 + $0x10] sm:$0xff]  ;;  %v555_v28 = vpack.c.bf16 %v220_v22, %v218_v21 }
  0x4a   :  { %490 = vmatprep.subr.bf16.mxu0 %v489_v51  ;;  %v776_v29 = vld [vmem:[%s790_s0] sm:$0x3]  ;;  %v557_v30 = vpack.c.bf16 %v225_v24, %v223_v23  ;;  %v224_v32 = vld [vmem:[#allocation4 + $0xd0] sm:$0xff]  ;;  %v503_v33 = vpack.c.bf16 %v264_v27, %v262_v26  ;;  %v227_v34 = vld [vmem:[#allocation4 + $0xe8] sm:$0xff] }
  0x4b   :  { %v222_v31 = vld [vmem:[#allocation4 + $0xc0] sm:$0xff]  ;;  %v229_v35 = vld [vmem:[#allocation4 + $0xf8] sm:$0xff]  ;;  %v228_v39 = vld [vmem:[#allocation4 + $0xf0] sm:$0xff] }
  0x4c   :  { %548 = vmatpush1.bf16.msra.mxu1 %v547_v6  ;;  %v559_v36 = vpack.c.bf16 %v224_v32, %v222_v31  ;;  %v561_v37 = vpack.c.bf16 %v229_v35, %v227_v34  ;;  %v226_v38 = vld [vmem:[#allocation4 + $0xe0] sm:$0xff]  ;;  %v231_v40 = vld [vmem:[#allocation4 + $0x108] sm:$0xff]  ;;  %v233_v41 = vld [vmem:[#allocation4 + $0x118] sm:$0xff] }
  0x4d   :  { %492 = vmatpush1.bf16.msra.mxu0 %v491_v58  ;;  %550 = vmatprep.subr.bf16.mxu1 %v549_v9  ;;  %v563_v42 = vpack.c.bf16 %v228_v39, %v226_v38  ;;  %v565_v43 = vpack.c.bf16 %v233_v41, %v231_v40  ;;  %v230_v44 = vld [vmem:[#allocation4 + $0x100] sm:$0xff]  ;;  %v232_v45 = vld [vmem:[#allocation4 + $0x110] sm:$0xff]  ;;  %v267_v47 = vld [vmem:[#allocation6 + $0x28] sm:$0xff] }
  0x4e   :  { %494 = vmatprep.subr.bf16.mxu0 %v493_v63  ;;  %v567_v46 = vpack.c.bf16 %v232_v45, %v230_v44  ;;  %v269_v48 = vld [vmem:[#allocation6 + $0x38] sm:$0xff]  ;;  %v266_v50 = vld [vmem:[#allocation6 + $0x20] sm:$0xff]  ;;  %v268_v51 = vld [vmem:[#allocation6 + $0x30] sm:$0xff] }
  0x4f   :  { %v505_v49 = vpack.c.bf16 %v269_v48, %v267_v47  ;;  %v235_v52 = vld [vmem:[#allocation4 + $0x128] sm:$0xff]  ;;  %v507_v53 = vpack.c.bf16 %v268_v51, %v266_v50  ;;  %v237_v54 = vld [vmem:[#allocation4 + $0x138] sm:$0xff]  ;;  %v234_v55 = vld [vmem:[#allocation4 + $0x120] sm:$0xff] }
  0x50   :  { %552 = vmatpush1.bf16.msra.mxu1 %v551_v18  ;;  %v569_v56 = vpack.c.bf16 %v237_v54, %v235_v52  ;;  %v271_v58 = vld [vmem:[#allocation6 + $0x48] sm:$0xff]  ;;  %v273_v59 = vld [vmem:[#allocation6 + $0x58] sm:$0xff]  ;;  %v270_v61 = vld [vmem:[#allocation6 + $0x40] sm:$0xff] }
  0x51   :  { %496 = vmatpush1.bf16.msra.mxu0 %v495_v7  ;;  %554 = vmatprep.subr.bf16.mxu1 %v553_v20  ;;  %v509_v60 = vpack.c.bf16 %v273_v59, %v271_v58  ;;  %v272_v62 = vld [vmem:[#allocation6 + $0x50] sm:$0xff]  ;;  %v239_v63 = vld [vmem:[#allocation4 + $0x148] sm:$0xff]  ;;  %v241_v2 = vld [vmem:[#allocation4 + $0x158] sm:$0xff] }
  0x52   :  { %498 = vmatprep.subr.bf16.mxu0 %v497_v12  ;;  %v511_v1 = vpack.c.bf16 %v272_v62, %v270_v61  ;;  %v238_v3 = vld [vmem:[#allocation4 + $0x140] sm:$0xff]  ;;  %v240_v4 = vld [vmem:[#allocation4 + $0x150] sm:$0xff]  ;;  %v573_v5 = vpack.c.bf16 %v241_v2, %v239_v63  ;;  %v275_v7 = vld [vmem:[#allocation6 + $0x68] sm:$0xff] }
  0x53   :  { %v575_v6 = vpack.c.bf16 %v240_v4, %v238_v3  ;;  %v277_v8 = vld [vmem:[#allocation6 + $0x78] sm:$0xff]  ;;  %v274_v10 = vld [vmem:[#allocation6 + $0x60] sm:$0xff]  ;;  %v276_v11 = vld [vmem:[#allocation6 + $0x70] sm:$0xff]  ;;  %v99_v4 = vlaneseq }
  0x54   :  { %556 = vmatpush1.bf16.msra.mxu1 %v555_v28  ;;  %v513_v9 = vpack.c.bf16 %v277_v8, %v275_v7  ;;  %v243_v12 = vld [vmem:[#allocation4 + $0x168] sm:$0xff]  ;;  %v515_v13 = vpack.c.bf16 %v276_v11, %v274_v10  ;;  %v245_v14 = vld [vmem:[#allocation4 + $0x178] sm:$0xff]  ;;  %v242_v15 = vld [vmem:[#allocation4 + $0x160] sm:$0xff] }
  0x55   :  { %500 = vmatpush1.bf16.msra.mxu0 %v499_v19  ;;  %558 = vmatprep.subr.bf16.mxu1 %v557_v30  ;;  %v244_v16 = vld [vmem:[#allocation4 + $0x170] sm:$0xff]  ;;  %v577_v17 = vpack.c.bf16 %v245_v14, %v243_v12  ;;  %v279_v19 = vld [vmem:[#allocation6 + $0x88] sm:$0xff]  ;;  %v281_v20 = vld [vmem:[#allocation6 + $0x98] sm:$0xff] }
  0x56   :  { %502 = vmatprep.subr.bf16.mxu0 %v501_v25  ;;  %v579_v18 = vpack.c.bf16 %v244_v16, %v242_v15  ;;  %v517_v21 = vpack.c.bf16 %v281_v20, %v279_v19  ;;  %v278_v22 = vld [vmem:[#allocation6 + $0x80] sm:$0xff]  ;;  %v280_v23 = vld [vmem:[#allocation6 + $0x90] sm:$0xff]  ;;  %v247_v24 = vld [vmem:[#allocation4 + $0x188] sm:$0xff] }
  0x57   :  { %v519_v25 = vpack.c.bf16 %v280_v23, %v278_v22  ;;  %v249_v26 = vld [vmem:[#allocation4 + $0x198] sm:$0xff]  ;;  %v246_v27 = vld [vmem:[#allocation4 + $0x180] sm:$0xff]  ;;  %v248_v28 = vld [vmem:[#allocation4 + $0x190] sm:$0xff] }
  0x58   :  { %174 = vmatmul.mubr.f32.vlgmr.msra.gmra.mrb[0].mxu0 %v776_v29  ;;  %560 = vmatpush1.bf16.msra.mxu1 %v559_v36  ;;  %v581_v30 = vpack.c.bf16 %v249_v26, %v247_v24  ;;  %v583_v31 = vpack.c.bf16 %v248_v28, %v246_v27  ;;  %v283_v32 = vld [vmem:[#allocation6 + $0xa8] sm:$0xff]  ;;  %v282_v34 = vld [vmem:[#allocation6 + $0xa0] sm:$0xff]  ;;  %v284_v36 = vld [vmem:[#allocation6 + $0xb0] sm:$0xff] }
  0x59   :  { %504 = vmatpush1.bf16.msra.mxu0 %v503_v33  ;;  %358 = vmatprep.mubr.f32.mxu0 %v684_v0  ;;  %v236_v0 = vld [vmem:[#allocation4 + $0x130] sm:$0xff]  ;;  %v285_v33 = vld [vmem:[#allocation6 + $0xb8] sm:$0xff]  ;;  %v523_v39 = vpack.c.bf16 %v284_v36, %v282_v34  ;;  %v250_v41 = vld [vmem:[#allocation4 + $0x1a0] sm:$0xff] }
  0x5a   :  { %562 = vmatprep.subr.bf16.mxu1 %v561_v37  ;;  %506 = vmatprep.subr.bf16.mxu0 %v505_v49  ;;  %v571_v57 = vpack.c.bf16 %v236_v0, %v234_v55  ;;  %v521_v35 = vpack.c.bf16 %v285_v33, %v283_v32  ;;  %v251_v37 = vld [vmem:[#allocation4 + $0x1a8] sm:$0xff]  ;;  %v253_v38 = vld [vmem:[#allocation4 + $0x1b8] sm:$0xff]  ;;  %v288_v47 = vld [vmem:[#allocation6 + $0xd0] sm:$0xff] }
  0x5b   :  { %v585_v40 = vpack.c.bf16 %v253_v38, %v251_v37  ;;  %v289_v45 = vld [vmem:[#allocation6 + $0xd8] sm:$0xff]  ;;  %v255_v49 = vld [vmem:[#allocation4 + $0x1c8] sm:$0xff]  ;;  %v254_v51 = vld [vmem:[#allocation4 + $0x1c0] sm:$0xff] }
  0x5c   :  { %564 = vmatpush1.bf16.msra.mxu1 %v563_v42  ;;  %v252_v42 = vld [vmem:[#allocation4 + $0x1b0] sm:$0xff]  ;;  %v257_v50 = vld [vmem:[#allocation4 + $0x1d8] sm:$0xff]  ;;  %v291_v55 = vld [vmem:[#allocation6 + $0xe8] sm:$0xff] }
  0x5d   :  { %566 = vmatprep.subr.bf16.mxu1 %v565_v43  ;;  %508 = vmatpush1.bf16.msra.mxu0 %v507_v53  ;;  %v287_v43 = vld [vmem:[#allocation6 + $0xc8] sm:$0xff]  ;;  %v587_v44 = vpack.c.bf16 %v252_v42, %v250_v41  ;;  %v589_v53 = vpack.c.bf16 %v257_v50, %v255_v49  ;;  %v256_v54 = vld [vmem:[#allocation4 + $0x1d0] sm:$0xff]  ;;  %v293_v0 = vld [vmem:[#allocation6 + $0xf8] sm:$0xff] }
  0x5e   :  { %510 = vmatprep.subr.bf16.mxu0 %v509_v60  ;;  %v525_v48 = vpack.c.bf16 %v289_v45, %v287_v43  ;;  %v292_v58 = vld [vmem:[#allocation6 + $0xf0] sm:$0xff]  ;;  %v259_v59 = vld [vmem:[#allocation4 + $0x1e8] sm:$0xff]  ;;  %v591_v60 = vpack.c.bf16 %v256_v54, %v254_v51  ;;  %v261_v61 = vld [vmem:[#allocation4 + $0x1f8] sm:$0xff] }
  0x5f   :  { %v593_v62 = vpack.c.bf16 %v261_v61, %v259_v59  ;;  %v258_v63 = vld [vmem:[#allocation4 + $0x1e0] sm:$0xff] }
  0x60   :  { %568 = vmatpush1.bf16.msra.mxu1 %v567_v46  ;;  %v286_v46 = vld [vmem:[#allocation6 + $0xc0] sm:$0xff] }
  0x61   :  { %570 = vmatprep.subr.bf16.mxu1 %v569_v56  ;;  %512 = vmatpush1.bf16.msra.mxu0 %v511_v1  ;;  %v527_v52 = vpack.c.bf16 %v288_v47, %v286_v46  ;;  %v529_v56 = vpack.c.bf16 %v293_v0, %v291_v55  ;;  %v260_v1 = vld [vmem:[#allocation4 + $0x1f0] sm:$0xff]  ;;  %v97_v7 = vld [vmem:[%s792_s2] sm:$0x3] }
  0x62   :  { %514 = vmatprep.subr.bf16.mxu0 %v513_v9  ;;  %v595_v3 = vpack.c.bf16 %v260_v1, %v258_v63 }
  0x64   :  { %572 = vmatpush1.bf16.msra.mxu1 %v571_v57  ;;  %v290_v57 = vld [vmem:[#allocation6 + $0xe0] sm:$0xff] }
  0x65   :  { %574 = vmatprep.subr.bf16.mxu1 %v573_v5  ;;  %516 = vmatpush1.bf16.msra.mxu0 %v515_v13  ;;  %v531_v2 = vpack.c.bf16 %v292_v58, %v290_v57  ;;  %v100_v5 = vshrl.u32 %v99_v4, 7 }
  0x66   :  { %518 = vmatprep.subr.bf16.mxu0 %v517_v21 }
  0x67   :  { %v105_v8 = vsub.s32 1, %v100_v5 }
  0x68   :  { %576 = vmatpush1.bf16.msra.mxu1 %v575_v6  ;;  %v101_v6 = vsub.s32 0, %v100_v5 }
  0x69   :  { %578 = vmatprep.subr.bf16.mxu1 %v577_v17  ;;  %520 = vmatpush1.bf16.msra.mxu0 %v519_v25  ;;  %v106_v10 = vrot.slane %v97_v7, %v105_v8 }
  0x6a   :  { %522 = vmatprep.subr.bf16.mxu0 %v521_v35  ;;  %v102_v9 = vrot.slane %v97_v7, %v101_v6  ;;  %v436_v35 = vld [vmem:[%s795_s5] sm:$0x3] }
  0x6b   :  { %v441_v36 = vrot.slane %v436_v35, %v101_v6  ;;  %v445_v38 = vrot.slane %v436_v35, %v105_v8 }
  0x6c   :  { %580 = vmatpush1.bf16.msra.mxu1 %v579_v18 }
  0x6d   :  { %582 = vmatprep.subr.bf16.mxu1 %v581_v30  ;;  %524 = vmatpush1.bf16.msra.mxu0 %v523_v39 }
  0x6e   :  { %526 = vmatprep.subr.bf16.mxu0 %v525_v48 }
  0x70   :  { %584 = vmatpush1.bf16.msra.mxu1 %v583_v31 }
  0x71   :  { %586 = vmatprep.subr.bf16.mxu1 %v585_v40  ;;  %528 = vmatpush1.bf16.msra.mxu0 %v527_v52 }
  0x72   :  { %530 = vmatprep.subr.bf16.mxu0 %v529_v56 }
  0x74   :  { %588 = vmatpush1.bf16.msra.mxu1 %v587_v44 }
  0x75   :  { %590 = vmatprep.subr.bf16.mxu1 %v589_v53  ;;  %532 = vmatpush1.bf16.msra.mxu0 %v531_v2 }
  0x78   :  { %592 = vmatpush1.bf16.msra.mxu1 %v591_v60  ;;  %359 = vmatmul.mubr.f32.vlgmr.msra.gmra.mrb[2].mxu0 %v776_v29 }
  0x79   :  { %594 = vmatprep.subr.bf16.mxu1 %v593_v62 }
  0x7c   :  { %596 = vmatpush1.bf16.msra.mxu1 %v595_v3 }
 0x12b   :  { %v175_v11 = vpop.f32.mrb[0].mxu0 }
 0x12c   :  { %v176_v12 = vadd.f32 %v175_v11, %v102_v9  ;;  %v177_v13 = vpop.f32.mrb[1].mxu0 }
 0x12d   :  { %v178_v14 = vadd.f32 %v177_v13, %v106_v10 }
 0x12e   :  { %v182_v15 = vmul.f32 %v176_v12, %v176_v12  ;;  %v180_v30 = vmul.f32 0.5, %v176_v12 }
 0x12f   :  { %v183_v16 = vmul.f32 %v178_v14, %v178_v14  ;;  %v181_v27 = vmul.f32 0.5, %v178_v14 }
 0x130   :  { %v184_v17 = vmul.f32 %v182_v15, %v176_v12 }
 0x131   :  { %v185_v18 = vmul.f32 %v183_v16, %v178_v14 }
 0x132   :  { %v186_v19 = vmul.f32 0.044715, %v184_v17 }
 0x133   :  { %v187_v29 = vmul.f32 0.044715, %v185_v18 }
 0x134   :  { %v188_v20 = vadd.f32 %v186_v19, %v176_v12 }
 0x135   :  { %v189_v21 = vadd.f32 %v187_v29, %v178_v14 }
 0x136   :  { %v190_v22 = vmul.f32 0.7978846, %v188_v20 }
 0x137   :  { %v191_v23 = vmul.f32 0.7978846, %v189_v21 }
 0x138   :  { %605 = vtanh.f32 %v190_v22 }
 0x139   :  { %607 = vtanh.f32 %v191_v23 }
 0x142   :  { %v606_v24 = vpop.eup %605 }
 0x143   :  { %v608_v25 = vpop.eup %607  ;;  %v194_v26 = vadd.f32 1.0, %v606_v24 }
 0x144   :  { %v195_v28 = vadd.f32 1.0, %v608_v25 }
 0x145   :  { %v196_v32 = vmul.f32 %v194_v26, %v180_v30 }
 0x146   :  { %v197_v31 = vmul.f32 %v195_v28, %v181_v27 }
 0x148   :  { %429 = vmatprep.mubr.f32.mxu1 %v197_v31 }
 0x149   :  { %430 = vmatmul.mubr.f32.vlgmr.msra.gmra.mrb[0].mxu1 %v196_v32 }
 0x14b   :  { %v360_v33 = vpop.f32.mrb[2].mxu0 }
 0x14c   :  { %v362_v34 = vpop.f32.mrb[3].mxu0 }
 0x21c   :  { %v431_v37 = vpop.f32.mrb[0].mxu1 }
 0x21d   :  { %v432_v39 = vadd.f32 %v431_v37, %v360_v33  ;;  %v433_v40 = vpop.f32.mrb[1].mxu1 }
 0x21e   :  { %v434_v41 = vadd.f32 %v433_v40, %v362_v34 }
 0x21f   :  { %v448_v42 = vadd.f32 %v441_v36, %v432_v39 }
 0x220   :  { %v449_v43 = vadd.f32 %v445_v38, %v434_v41 }
 0x222   :  { %v452_v44 = vcombine.low %v448_v42, %v449_v43 }
 0x224   :  { %468 = vst.sshfl [vmem:[%s796_s6] sm:$0x33 pattern:$0x76325410] %v452_v44 }
 0x225   :  { %466 = vsyncpa [#allocation3], 1 }
 0x226   :  { %467 = vsyncpa [#allocation5], 1 }

</bundles_post_ra>
